<compile_context>
chip_gen: v7x
topology: tpu7x:2x2x1
jax: 0.10.0
libtpu: 0.0.40
codegen_flags: <defaults>
</compile_context>

<pallas_src>
import functools

import jax
import jax.numpy as jnp
from jax.experimental import pallas as pl
from jax.experimental.pallas import tpu as pltpu

LANE = 128   # vreg lane width
SUB = 8      # vreg sublane width
VPU_MAX_FAN_IN = 32  # layers with f_in <= this use the exact-f32 VPU path (skip MXU)


def _round_up(x, m):
    return (x + m - 1) // m * m


def _mlp_kernel(x_ref, slab_ref, out_ref, *, layer_dims):
    """x_ref: (TM, 128) f32, slab_ref: (num_layers*(128+8), 128) f32, out_ref: (TM, 128) f32.

    Slab layout per layer i (row offset i*(128+8)):
      rows [0, 128)   : W padded to (128, 128), real data in [:f_in, :f_out]
      rows [128, 136) : bias block (8, 128), real data in row 0, [:f_out]
    Padding is zero, so padded lanes stay exactly zero through every layer.
    """
    h = x_ref[...].astype(jnp.float32)            # (TM, 128)
    row = 0
    for (f_in, f_out) in layer_dims:
        w_row0 = row
        b_row0 = row + LANE
        row = b_row0 + SUB

        b_blk = slab_ref[b_row0:b_row0 + SUB, :]  # clean 8-aligned (8,128) load
        b = b_blk[0:1, :]                         # (1, 128)

        if f_in <= VPU_MAX_FAN_IN:
            # VPU broadcast-FMA path: exact f32, no MXU padding / MRF drain.
            f_in_pad = _round_up(f_in, SUB)
            w = slab_ref[w_row0:w_row0 + f_in_pad, :]      # (f_in_pad, 128)
            acc = jnp.broadcast_to(b, h.shape)
            for k in range(f_in):
                acc = acc + h[:, k:k + 1] * w[k:k + 1, :]
            h = jnp.tanh(acc)
        else:
            # Wide-layer fallback: lane-dense (TM,128)@(128,128) matmul on the MXU.
            w = slab_ref[w_row0:w_row0 + LANE, :]          # (128, 128)
            acc = jnp.dot(h, w,
                          preferred_element_type=jnp.float32,
                          precision=jax.lax.Precision.HIGHEST) + b
            h = jnp.tanh(acc)

    out_ref[...] = h.astype(out_ref.dtype)


def pack_core_shifter_params(params):
    """Pack [(W, b)] (W: (f_in, f_out) = torch W transposed, b: (f_out,)) into one slab.

    Returns (slab, layer_dims) where slab is (num_layers*(128+8), 128) f32 and
    layer_dims is a static tuple of (f_in, f_out).
    """
    blocks = []
    layer_dims = []
    for w, b in params:
        f_in, f_out = w.shape
        assert f_in <= LANE and f_out <= LANE, "CoreShifter layers must fit one lane tile"
        wp = jnp.zeros((LANE, LANE), jnp.float32).at[:f_in, :f_out].set(
            w.astype(jnp.float32))
        bp = jnp.zeros((SUB, LANE), jnp.float32).at[0, :f_out].set(
            jnp.reshape(b, (-1,)).astype(jnp.float32))
        blocks.append(wp)
        blocks.append(bp)
        layer_dims.append((int(f_in), int(f_out)))
    slab = jnp.concatenate(blocks, axis=0)
    return slab, tuple(layer_dims)


def core_shifter_forward(pupil_center, slab, layer_dims):
    """Run the CoreShifter MLP.

    pupil_center: (batch, in_features) float32
    slab:         packed params from pack_core_shifter_params
    returns:      (batch, 2) float32
    """
    batch, in_feat = pupil_center.shape
    assert layer_dims[0][0] == in_feat

    # Batch tile: full (8-rounded) batch if small, else 512-row blocks sharded
    # across cores ("parallel" -> up to 2x on v7x's two TensorCores).
    tm = min(512, _round_up(batch, SUB))
    batch_pad = _round_up(batch, tm)

    # Lane-pad the input to a clean (batch_pad, 128) slab (zeros beyond f_in / batch).
    x = jnp.zeros((batch_pad, LANE), jnp.float32)
    x = x.at[:batch, :in_feat].set(pupil_center.astype(jnp.float32))

    total_rows = slab.shape[0]
    grid = (batch_pad // tm,)

    flops = 2 * batch_pad * sum(fi * fo for fi, fo in layer_dims)
    transcendentals = batch_pad * sum(fo for _, fo in layer_dims)
    bytes_accessed = (x.size + slab.size + batch_pad * LANE) * 4

    kernel = functools.partial(_mlp_kernel, layer_dims=layer_dims)

    out = pl.pallas_call(
        kernel,
        out_shape=jax.ShapeDtypeStruct((batch_pad, LANE), jnp.float32),
        grid=grid,
        in_specs=[
            pl.BlockSpec((tm, LANE), lambda i: (i, 0)),          # batch tile of x
            pl.BlockSpec((total_rows, LANE), lambda i: (0, 0)),  # whole param slab, resident
        ],
        out_specs=pl.BlockSpec((tm, LANE), lambda i: (i, 0)),
        compiler_params=pltpu.CompilerParams(
            dimension_semantics=("parallel",)),
        cost_estimate=pl.CostEstimate(
            flops=flops,
            transcendentals=transcendentals,
            bytes_accessed=bytes_accessed),
    )(x, slab)

    return out[:batch, :2]


def init_core_shifter_params(key, in_features, hidden_features, num_layers):
    """Deterministic init mirroring the PyTorch module's layer shapes.

    Weights are stored transposed relative to torch.nn.Linear: (f_in, f_out).
    """
    params = []
    out_features = in_features
    dims = []
    for _ in range(num_layers - 1):
        dims.append((out_features, hidden_features))
        out_features = hidden_features
    dims.append((out_features, 2))

    for (f_in, f_out) in dims:
        key, kw, kb = jax.random.split(key, 3)
        bound = 1.0 / jnp.sqrt(jnp.float32(f_in))  # torch Linear default U(-1/sqrt(in), 1/sqrt(in))
        w = jax.random.uniform(kw, (f_in, f_out), jnp.float32, -bound, bound)
        b = jax.random.uniform(kb, (f_out,), jnp.float32, -bound, bound)
        params.append((w, b))
    return params


def core_shifter_reference(pupil_center, params):
    """Pure-JAX reference (exact f32 matmuls) for correctness checking."""
    h = pupil_center.astype(jnp.float32)
    for w, b in params:
        h = jnp.tanh(
            jnp.dot(h, w, precision=jax.lax.Precision.HIGHEST) + b[None, :])
    return h


if __name__ == "__main__":
    # Small shapes consistent with the module: pupil_center is (batch, in_features),
    # typical in_features = 2 (x, y of pupil), a few hidden units, 2 outputs.
    batch = 8
    in_features = 2
    hidden_features = 16
    num_layers = 3

    key = jax.random.PRNGKey(0)
    key, kx = jax.random.split(key)
    pupil_center = jax.random.normal(kx, (batch, in_features), jnp.float32)

    params = init_core_shifter_params(key, in_features, hidden_features, num_layers)
    slab, layer_dims = pack_core_shifter_params(params)

    out = core_shifter_forward(pupil_center, slab, layer_dims)
    out = jax.block_until_ready(out)

    ref = core_shifter_reference(pupil_center, params)
    assert out.shape == (batch, 2), out.shape
    assert jnp.allclose(out, ref, atol=1e-5, rtol=1e-5), "Pallas output mismatch vs reference"

    # TODO(synk): regularizer() (reg_scale * L1-sum of parameters) is host-side glue,
    # not a hot-path kernel; compute it in plain JAX if needed.
    print("KERNEL_OK")
</pallas_src>

<mosaic_0001>
module attributes {stable_mosaic.version = 11 : i64} {
  func.func @_mlp_kernel(%arg0: i32, %arg1: memref<8x128xf32, #tpu.memory_space<vmem>>, %arg2: memref<408x128xf32, #tpu.memory_space<vmem>>, %arg3: memref<8x128xf32, #tpu.memory_space<vmem>>) attributes {dimension_semantics = [#tpu.dimension_semantics<parallel>], iteration_bounds = array<i64: 1>, scalar_prefetch = 0 : i64, scratch_operands = 0 : i64, tpu.core_type = #tpu.core_type<tc>, window_params = [{transform_indices = @transform_0, window_bounds = array<i64: 8, 128>}, {pipeline_mode = #tpu.pipeline_mode<synchronous>, transform_indices = @transform_1, window_bounds = array<i64: 408, 128>}, {transform_indices = @transform_2, window_bounds = array<i64: 8, 128>}]} {
    %c0 = arith.constant 0 : index
    %c0_0 = arith.constant 0 : index
    %0 = vector.load %arg1[%c0, %c0_0] : memref<8x128xf32, #tpu.memory_space<vmem>>, vector<8x128xf32>
    %c128 = arith.constant 128 : index
    %c0_1 = arith.constant 0 : index
    %1 = vector.load %arg2[%c128, %c0_1] : memref<408x128xf32, #tpu.memory_space<vmem>>, vector<8x128xf32>
    %2 = vector.extract_strided_slice %1 {offsets = [0, 0], sizes = [1, 128], strides = [1, 1]} : vector<8x128xf32> to vector<1x128xf32>
    %c0_2 = arith.constant 0 : index
    %c0_3 = arith.constant 0 : index
    %3 = vector.load %arg2[%c0_2, %c0_3] : memref<408x128xf32, #tpu.memory_space<vmem>>, vector<8x128xf32>
    %4 = vector.shape_cast %2 : vector<1x128xf32> to vector<1x128xf32>
    %5 = vector.broadcast %4 : vector<1x128xf32> to vector<8x128xf32>
    %6 = vector.extract_strided_slice %0 {offsets = [0, 0], sizes = [8, 1], strides = [1, 1]} : vector<8x128xf32> to vector<8x1xf32>
    %7 = vector.extract_strided_slice %3 {offsets = [0, 0], sizes = [1, 128], strides = [1, 1]} : vector<8x128xf32> to vector<1x128xf32>
    %8 = vector.broadcast %6 : vector<8x1xf32> to vector<8x128xf32>
    %9 = vector.broadcast %7 : vector<1x128xf32> to vector<8x128xf32>
    %10 = arith.mulf %8, %9 : vector<8x128xf32>
    %11 = arith.addf %5, %10 : vector<8x128xf32>
    %12 = vector.extract_strided_slice %0 {offsets = [0, 1], sizes = [8, 1], strides = [1, 1]} : vector<8x128xf32> to vector<8x1xf32>
    %13 = vector.extract_strided_slice %3 {offsets = [1, 0], sizes = [1, 128], strides = [1, 1]} : vector<8x128xf32> to vector<1x128xf32>
    %14 = vector.broadcast %12 : vector<8x1xf32> to vector<8x128xf32>
    %15 = vector.broadcast %13 : vector<1x128xf32> to vector<8x128xf32>
    %16 = arith.mulf %14, %15 : vector<8x128xf32>
    %17 = arith.addf %11, %16 : vector<8x128xf32>
    %18 = math.tanh %17 : vector<8x128xf32>
    %c264 = arith.constant 264 : index
    %c0_4 = arith.constant 0 : index
    %19 = vector.load %arg2[%c264, %c0_4] : memref<408x128xf32, #tpu.memory_space<vmem>>, vector<8x128xf32>
    %20 = vector.extract_strided_slice %19 {offsets = [0, 0], sizes = [1, 128], strides = [1, 1]} : vector<8x128xf32> to vector<1x128xf32>
    %c136 = arith.constant 136 : index
    %c0_5 = arith.constant 0 : index
    %21 = vector.load %arg2[%c136, %c0_5] : memref<408x128xf32, #tpu.memory_space<vmem>>, vector<16x128xf32>
    %22 = vector.shape_cast %20 : vector<1x128xf32> to vector<1x128xf32>
    %23 = vector.broadcast %22 : vector<1x128xf32> to vector<8x128xf32>
    %24 = vector.extract_strided_slice %18 {offsets = [0, 0], sizes = [8, 1], strides = [1, 1]} : vector<8x128xf32> to vector<8x1xf32>
    %25 = vector.extract_strided_slice %21 {offsets = [0, 0], sizes = [1, 128], strides = [1, 1]} : vector<16x128xf32> to vector<1x128xf32>
    %26 = vector.broadcast %24 : vector<8x1xf32> to vector<8x128xf32>
    %27 = vector.broadcast %25 : vector<1x128xf32> to vector<8x128xf32>
    %28 = arith.mulf %26, %27 : vector<8x128xf32>
    %29 = arith.addf %23, %28 : vector<8x128xf32>
    %30 = vector.extract_strided_slice %18 {offsets = [0, 1], sizes = [8, 1], strides = [1, 1]} : vector<8x128xf32> to vector<8x1xf32>
    %31 = vector.extract_strided_slice %21 {offsets = [1, 0], sizes = [1, 128], strides = [1, 1]} : vector<16x128xf32> to vector<1x128xf32>
    %32 = vector.broadcast %30 : vector<8x1xf32> to vector<8x128xf32>
    %33 = vector.broadcast %31 : vector<1x128xf32> to vector<8x128xf32>
    %34 = arith.mulf %32, %33 : vector<8x128xf32>
    %35 = arith.addf %29, %34 : vector<8x128xf32>
    %36 = vector.extract_strided_slice %18 {offsets = [0, 2], sizes = [8, 1], strides = [1, 1]} : vector<8x128xf32> to vector<8x1xf32>
    %37 = vector.extract_strided_slice %21 {offsets = [2, 0], sizes = [1, 128], strides = [1, 1]} : vector<16x128xf32> to vector<1x128xf32>
    %38 = vector.broadcast %36 : vector<8x1xf32> to vector<8x128xf32>
    %39 = vector.broadcast %37 : vector<1x128xf32> to vector<8x128xf32>
    %40 = arith.mulf %38, %39 : vector<8x128xf32>
    %41 = arith.addf %35, %40 : vector<8x128xf32>
    %42 = vector.extract_strided_slice %18 {offsets = [0, 3], sizes = [8, 1], strides = [1, 1]} : vector<8x128xf32> to vector<8x1xf32>
    %43 = vector.extract_strided_slice %21 {offsets = [3, 0], sizes = [1, 128], strides = [1, 1]} : vector<16x128xf32> to vector<1x128xf32>
    %44 = vector.broadcast %42 : vector<8x1xf32> to vector<8x128xf32>
    %45 = vector.broadcast %43 : vector<1x128xf32> to vector<8x128xf32>
    %46 = arith.mulf %44, %45 : vector<8x128xf32>
    %47 = arith.addf %41, %46 : vector<8x128xf32>
    %48 = vector.extract_strided_slice %18 {offsets = [0, 4], sizes = [8, 1], strides = [1, 1]} : vector<8x128xf32> to vector<8x1xf32>
    %49 = vector.extract_strided_slice %21 {offsets = [4, 0], sizes = [1, 128], strides = [1, 1]} : vector<16x128xf32> to vector<1x128xf32>
    %50 = vector.broadcast %48 : vector<8x1xf32> to vector<8x128xf32>
    %51 = vector.broadcast %49 : vector<1x128xf32> to vector<8x128xf32>
    %52 = arith.mulf %50, %51 : vector<8x128xf32>
    %53 = arith.addf %47, %52 : vector<8x128xf32>
    %54 = vector.extract_strided_slice %18 {offsets = [0, 5], sizes = [8, 1], strides = [1, 1]} : vector<8x128xf32> to vector<8x1xf32>
    %55 = vector.extract_strided_slice %21 {offsets = [5, 0], sizes = [1, 128], strides = [1, 1]} : vector<16x128xf32> to vector<1x128xf32>
    %56 = vector.broadcast %54 : vector<8x1xf32> to vector<8x128xf32>
    %57 = vector.broadcast %55 : vector<1x128xf32> to vector<8x128xf32>
    %58 = arith.mulf %56, %57 : vector<8x128xf32>
    %59 = arith.addf %53, %58 : vector<8x128xf32>
    %60 = vector.extract_strided_slice %18 {offsets = [0, 6], sizes = [8, 1], strides = [1, 1]} : vector<8x128xf32> to vector<8x1xf32>
    %61 = vector.extract_strided_slice %21 {offsets = [6, 0], sizes = [1, 128], strides = [1, 1]} : vector<16x128xf32> to vector<1x128xf32>
    %62 = vector.broadcast %60 : vector<8x1xf32> to vector<8x128xf32>
    %63 = vector.broadcast %61 : vector<1x128xf32> to vector<8x128xf32>
    %64 = arith.mulf %62, %63 : vector<8x128xf32>
    %65 = arith.addf %59, %64 : vector<8x128xf32>
    %66 = vector.extract_strided_slice %18 {offsets = [0, 7], sizes = [8, 1], strides = [1, 1]} : vector<8x128xf32> to vector<8x1xf32>
    %67 = vector.extract_strided_slice %21 {offsets = [7, 0], sizes = [1, 128], strides = [1, 1]} : vector<16x128xf32> to vector<1x128xf32>
    %68 = vector.broadcast %66 : vector<8x1xf32> to vector<8x128xf32>
    %69 = vector.broadcast %67 : vector<1x128xf32> to vector<8x128xf32>
    %70 = arith.mulf %68, %69 : vector<8x128xf32>
    %71 = arith.addf %65, %70 : vector<8x128xf32>
    %72 = vector.extract_strided_slice %18 {offsets = [0, 8], sizes = [8, 1], strides = [1, 1]} : vector<8x128xf32> to vector<8x1xf32>
    %73 = vector.extract_strided_slice %21 {offsets = [8, 0], sizes = [1, 128], strides = [1, 1]} : vector<16x128xf32> to vector<1x128xf32>
    %74 = vector.broadcast %72 : vector<8x1xf32> to vector<8x128xf32>
    %75 = vector.broadcast %73 : vector<1x128xf32> to vector<8x128xf32>
    %76 = arith.mulf %74, %75 : vector<8x128xf32>
    %77 = arith.addf %71, %76 : vector<8x128xf32>
    %78 = vector.extract_strided_slice %18 {offsets = [0, 9], sizes = [8, 1], strides = [1, 1]} : vector<8x128xf32> to vector<8x1xf32>
    %79 = vector.extract_strided_slice %21 {offsets = [9, 0], sizes = [1, 128], strides = [1, 1]} : vector<16x128xf32> to vector<1x128xf32>
    %80 = vector.broadcast %78 : vector<8x1xf32> to vector<8x128xf32>
    %81 = vector.broadcast %79 : vector<1x128xf32> to vector<8x128xf32>
    %82 = arith.mulf %80, %81 : vector<8x128xf32>
    %83 = arith.addf %77, %82 : vector<8x128xf32>
    %84 = vector.extract_strided_slice %18 {offsets = [0, 10], sizes = [8, 1], strides = [1, 1]} : vector<8x128xf32> to vector<8x1xf32>
    %85 = vector.extract_strided_slice %21 {offsets = [10, 0], sizes = [1, 128], strides = [1, 1]} : vector<16x128xf32> to vector<1x128xf32>
    %86 = vector.broadcast %84 : vector<8x1xf32> to vector<8x128xf32>
    %87 = vector.broadcast %85 : vector<1x128xf32> to vector<8x128xf32>
    %88 = arith.mulf %86, %87 : vector<8x128xf32>
    %89 = arith.addf %83, %88 : vector<8x128xf32>
    %90 = vector.extract_strided_slice %18 {offsets = [0, 11], sizes = [8, 1], strides = [1, 1]} : vector<8x128xf32> to vector<8x1xf32>
    %91 = vector.extract_strided_slice %21 {offsets = [11, 0], sizes = [1, 128], strides = [1, 1]} : vector<16x128xf32> to vector<1x128xf32>
    %92 = vector.broadcast %90 : vector<8x1xf32> to vector<8x128xf32>
    %93 = vector.broadcast %91 : vector<1x128xf32> to vector<8x128xf32>
    %94 = arith.mulf %92, %93 : vector<8x128xf32>
    %95 = arith.addf %89, %94 : vector<8x128xf32>
    %96 = vector.extract_strided_slice %18 {offsets = [0, 12], sizes = [8, 1], strides = [1, 1]} : vector<8x128xf32> to vector<8x1xf32>
    %97 = vector.extract_strided_slice %21 {offsets = [12, 0], sizes = [1, 128], strides = [1, 1]} : vector<16x128xf32> to vector<1x128xf32>
    %98 = vector.broadcast %96 : vector<8x1xf32> to vector<8x128xf32>
    %99 = vector.broadcast %97 : vector<1x128xf32> to vector<8x128xf32>
    %100 = arith.mulf %98, %99 : vector<8x128xf32>
    %101 = arith.addf %95, %100 : vector<8x128xf32>
    %102 = vector.extract_strided_slice %18 {offsets = [0, 13], sizes = [8, 1], strides = [1, 1]} : vector<8x128xf32> to vector<8x1xf32>
    %103 = vector.extract_strided_slice %21 {offsets = [13, 0], sizes = [1, 128], strides = [1, 1]} : vector<16x128xf32> to vector<1x128xf32>
    %104 = vector.broadcast %102 : vector<8x1xf32> to vector<8x128xf32>
    %105 = vector.broadcast %103 : vector<1x128xf32> to vector<8x128xf32>
    %106 = arith.mulf %104, %105 : vector<8x128xf32>
    %107 = arith.addf %101, %106 : vector<8x128xf32>
    %108 = vector.extract_strided_slice %18 {offsets = [0, 14], sizes = [8, 1], strides = [1, 1]} : vector<8x128xf32> to vector<8x1xf32>
    %109 = vector.extract_strided_slice %21 {offsets = [14, 0], sizes = [1, 128], strides = [1, 1]} : vector<16x128xf32> to vector<1x128xf32>
    %110 = vector.broadcast %108 : vector<8x1xf32> to vector<8x128xf32>
    %111 = vector.broadcast %109 : vector<1x128xf32> to vector<8x128xf32>
    %112 = arith.mulf %110, %111 : vector<8x128xf32>
    %113 = arith.addf %107, %112 : vector<8x128xf32>
    %114 = vector.extract_strided_slice %18 {offsets = [0, 15], sizes = [8, 1], strides = [1, 1]} : vector<8x128xf32> to vector<8x1xf32>
    %115 = vector.extract_strided_slice %21 {offsets = [15, 0], sizes = [1, 128], strides = [1, 1]} : vector<16x128xf32> to vector<1x128xf32>
    %116 = vector.broadcast %114 : vector<8x1xf32> to vector<8x128xf32>
    %117 = vector.broadcast %115 : vector<1x128xf32> to vector<8x128xf32>
    %118 = arith.mulf %116, %117 : vector<8x128xf32>
    %119 = arith.addf %113, %118 : vector<8x128xf32>
    %120 = math.tanh %119 : vector<8x128xf32>
    %c400 = arith.constant 400 : index
    %c0_6 = arith.constant 0 : index
    %121 = vector.load %arg2[%c400, %c0_6] : memref<408x128xf32, #tpu.memory_space<vmem>>, vector<8x128xf32>
    %122 = vector.extract_strided_slice %121 {offsets = [0, 0], sizes = [1, 128], strides = [1, 1]} : vector<8x128xf32> to vector<1x128xf32>
    %c272 = arith.constant 272 : index
    %c0_7 = arith.constant 0 : index
    %123 = vector.load %arg2[%c272, %c0_7] : memref<408x128xf32, #tpu.memory_space<vmem>>, vector<16x128xf32>
    %124 = vector.shape_cast %122 : vector<1x128xf32> to vector<1x128xf32>
    %125 = vector.broadcast %124 : vector<1x128xf32> to vector<8x128xf32>
    %126 = vector.extract_strided_slice %120 {offsets = [0, 0], sizes = [8, 1], strides = [1, 1]} : vector<8x128xf32> to vector<8x1xf32>
    %127 = vector.extract_strided_slice %123 {offsets = [0, 0], sizes = [1, 128], strides = [1, 1]} : vector<16x128xf32> to vector<1x128xf32>
    %128 = vector.broadcast %126 : vector<8x1xf32> to vector<8x128xf32>
    %129 = vector.broadcast %127 : vector<1x128xf32> to vector<8x128xf32>
    %130 = arith.mulf %128, %129 : vector<8x128xf32>
    %131 = arith.addf %125, %130 : vector<8x128xf32>
    %132 = vector.extract_strided_slice %120 {offsets = [0, 1], sizes = [8, 1], strides = [1, 1]} : vector<8x128xf32> to vector<8x1xf32>
    %133 = vector.extract_strided_slice %123 {offsets = [1, 0], sizes = [1, 128], strides = [1, 1]} : vector<16x128xf32> to vector<1x128xf32>
    %134 = vector.broadcast %132 : vector<8x1xf32> to vector<8x128xf32>
    %135 = vector.broadcast %133 : vector<1x128xf32> to vector<8x128xf32>
    %136 = arith.mulf %134, %135 : vector<8x128xf32>
    %137 = arith.addf %131, %136 : vector<8x128xf32>
    %138 = vector.extract_strided_slice %120 {offsets = [0, 2], sizes = [8, 1], strides = [1, 1]} : vector<8x128xf32> to vector<8x1xf32>
    %139 = vector.extract_strided_slice %123 {offsets = [2, 0], sizes = [1, 128], strides = [1, 1]} : vector<16x128xf32> to vector<1x128xf32>
    %140 = vector.broadcast %138 : vector<8x1xf32> to vector<8x128xf32>
    %141 = vector.broadcast %139 : vector<1x128xf32> to vector<8x128xf32>
    %142 = arith.mulf %140, %141 : vector<8x128xf32>
    %143 = arith.addf %137, %142 : vector<8x128xf32>
    %144 = vector.extract_strided_slice %120 {offsets = [0, 3], sizes = [8, 1], strides = [1, 1]} : vector<8x128xf32> to vector<8x1xf32>
    %145 = vector.extract_strided_slice %123 {offsets = [3, 0], sizes = [1, 128], strides = [1, 1]} : vector<16x128xf32> to vector<1x128xf32>
    %146 = vector.broadcast %144 : vector<8x1xf32> to vector<8x128xf32>
    %147 = vector.broadcast %145 : vector<1x128xf32> to vector<8x128xf32>
    %148 = arith.mulf %146, %147 : vector<8x128xf32>
    %149 = arith.addf %143, %148 : vector<8x128xf32>
    %150 = vector.extract_strided_slice %120 {offsets = [0, 4], sizes = [8, 1], strides = [1, 1]} : vector<8x128xf32> to vector<8x1xf32>
    %151 = vector.extract_strided_slice %123 {offsets = [4, 0], sizes = [1, 128], strides = [1, 1]} : vector<16x128xf32> to vector<1x128xf32>
    %152 = vector.broadcast %150 : vector<8x1xf32> to vector<8x128xf32>
    %153 = vector.broadcast %151 : vector<1x128xf32> to vector<8x128xf32>
    %154 = arith.mulf %152, %153 : vector<8x128xf32>
    %155 = arith.addf %149, %154 : vector<8x128xf32>
    %156 = vector.extract_strided_slice %120 {offsets = [0, 5], sizes = [8, 1], strides = [1, 1]} : vector<8x128xf32> to vector<8x1xf32>
    %157 = vector.extract_strided_slice %123 {offsets = [5, 0], sizes = [1, 128], strides = [1, 1]} : vector<16x128xf32> to vector<1x128xf32>
    %158 = vector.broadcast %156 : vector<8x1xf32> to vector<8x128xf32>
    %159 = vector.broadcast %157 : vector<1x128xf32> to vector<8x128xf32>
    %160 = arith.mulf %158, %159 : vector<8x128xf32>
    %161 = arith.addf %155, %160 : vector<8x128xf32>
    %162 = vector.extract_strided_slice %120 {offsets = [0, 6], sizes = [8, 1], strides = [1, 1]} : vector<8x128xf32> to vector<8x1xf32>
    %163 = vector.extract_strided_slice %123 {offsets = [6, 0], sizes = [1, 128], strides = [1, 1]} : vector<16x128xf32> to vector<1x128xf32>
    %164 = vector.broadcast %162 : vector<8x1xf32> to vector<8x128xf32>
    %165 = vector.broadcast %163 : vector<1x128xf32> to vector<8x128xf32>
    %166 = arith.mulf %164, %165 : vector<8x128xf32>
    %167 = arith.addf %161, %166 : vector<8x128xf32>
    %168 = vector.extract_strided_slice %120 {offsets = [0, 7], sizes = [8, 1], strides = [1, 1]} : vector<8x128xf32> to vector<8x1xf32>
    %169 = vector.extract_strided_slice %123 {offsets = [7, 0], sizes = [1, 128], strides = [1, 1]} : vector<16x128xf32> to vector<1x128xf32>
    %170 = vector.broadcast %168 : vector<8x1xf32> to vector<8x128xf32>
    %171 = vector.broadcast %169 : vector<1x128xf32> to vector<8x128xf32>
    %172 = arith.mulf %170, %171 : vector<8x128xf32>
    %173 = arith.addf %167, %172 : vector<8x128xf32>
    %174 = vector.extract_strided_slice %120 {offsets = [0, 8], sizes = [8, 1], strides = [1, 1]} : vector<8x128xf32> to vector<8x1xf32>
    %175 = vector.extract_strided_slice %123 {offsets = [8, 0], sizes = [1, 128], strides = [1, 1]} : vector<16x128xf32> to vector<1x128xf32>
    %176 = vector.broadcast %174 : vector<8x1xf32> to vector<8x128xf32>
    %177 = vector.broadcast %175 : vector<1x128xf32> to vector<8x128xf32>
    %178 = arith.mulf %176, %177 : vector<8x128xf32>
    %179 = arith.addf %173, %178 : vector<8x128xf32>
    %180 = vector.extract_strided_slice %120 {offsets = [0, 9], sizes = [8, 1], strides = [1, 1]} : vector<8x128xf32> to vector<8x1xf32>
    %181 = vector.extract_strided_slice %123 {offsets = [9, 0], sizes = [1, 128], strides = [1, 1]} : vector<16x128xf32> to vector<1x128xf32>
    %182 = vector.broadcast %180 : vector<8x1xf32> to vector<8x128xf32>
    %183 = vector.broadcast %181 : vector<1x128xf32> to vector<8x128xf32>
    %184 = arith.mulf %182, %183 : vector<8x128xf32>
    %185 = arith.addf %179, %184 : vector<8x128xf32>
    %186 = vector.extract_strided_slice %120 {offsets = [0, 10], sizes = [8, 1], strides = [1, 1]} : vector<8x128xf32> to vector<8x1xf32>
    %187 = vector.extract_strided_slice %123 {offsets = [10, 0], sizes = [1, 128], strides = [1, 1]} : vector<16x128xf32> to vector<1x128xf32>
    %188 = vector.broadcast %186 : vector<8x1xf32> to vector<8x128xf32>
    %189 = vector.broadcast %187 : vector<1x128xf32> to vector<8x128xf32>
    %190 = arith.mulf %188, %189 : vector<8x128xf32>
    %191 = arith.addf %185, %190 : vector<8x128xf32>
    %192 = vector.extract_strided_slice %120 {offsets = [0, 11], sizes = [8, 1], strides = [1, 1]} : vector<8x128xf32> to vector<8x1xf32>
    %193 = vector.extract_strided_slice %123 {offsets = [11, 0], sizes = [1, 128], strides = [1, 1]} : vector<16x128xf32> to vector<1x128xf32>
    %194 = vector.broadcast %192 : vector<8x1xf32> to vector<8x128xf32>
    %195 = vector.broadcast %193 : vector<1x128xf32> to vector<8x128xf32>
    %196 = arith.mulf %194, %195 : vector<8x128xf32>
    %197 = arith.addf %191, %196 : vector<8x128xf32>
    %198 = vector.extract_strided_slice %120 {offsets = [0, 12], sizes = [8, 1], strides = [1, 1]} : vector<8x128xf32> to vector<8x1xf32>
    %199 = vector.extract_strided_slice %123 {offsets = [12, 0], sizes = [1, 128], strides = [1, 1]} : vector<16x128xf32> to vector<1x128xf32>
    %200 = vector.broadcast %198 : vector<8x1xf32> to vector<8x128xf32>
    %201 = vector.broadcast %199 : vector<1x128xf32> to vector<8x128xf32>
    %202 = arith.mulf %200, %201 : vector<8x128xf32>
    %203 = arith.addf %197, %202 : vector<8x128xf32>
    %204 = vector.extract_strided_slice %120 {offsets = [0, 13], sizes = [8, 1], strides = [1, 1]} : vector<8x128xf32> to vector<8x1xf32>
    %205 = vector.extract_strided_slice %123 {offsets = [13, 0], sizes = [1, 128], strides = [1, 1]} : vector<16x128xf32> to vector<1x128xf32>
    %206 = vector.broadcast %204 : vector<8x1xf32> to vector<8x128xf32>
    %207 = vector.broadcast %205 : vector<1x128xf32> to vector<8x128xf32>
    %208 = arith.mulf %206, %207 : vector<8x128xf32>
    %209 = arith.addf %203, %208 : vector<8x128xf32>
    %210 = vector.extract_strided_slice %120 {offsets = [0, 14], sizes = [8, 1], strides = [1, 1]} : vector<8x128xf32> to vector<8x1xf32>
    %211 = vector.extract_strided_slice %123 {offsets = [14, 0], sizes = [1, 128], strides = [1, 1]} : vector<16x128xf32> to vector<1x128xf32>
    %212 = vector.broadcast %210 : vector<8x1xf32> to vector<8x128xf32>
    %213 = vector.broadcast %211 : vector<1x128xf32> to vector<8x128xf32>
    %214 = arith.mulf %212, %213 : vector<8x128xf32>
    %215 = arith.addf %209, %214 : vector<8x128xf32>
    %216 = vector.extract_strided_slice %120 {offsets = [0, 15], sizes = [8, 1], strides = [1, 1]} : vector<8x128xf32> to vector<8x1xf32>
    %217 = vector.extract_strided_slice %123 {offsets = [15, 0], sizes = [1, 128], strides = [1, 1]} : vector<16x128xf32> to vector<1x128xf32>
    %218 = vector.broadcast %216 : vector<8x1xf32> to vector<8x128xf32>
    %219 = vector.broadcast %217 : vector<1x128xf32> to vector<8x128xf32>
    %220 = arith.mulf %218, %219 : vector<8x128xf32>
    %221 = arith.addf %215, %220 : vector<8x128xf32>
    %222 = math.tanh %221 : vector<8x128xf32>
    %c0_8 = arith.constant 0 : index
    %c0_9 = arith.constant 0 : index
    %223 = vector.load %arg3[%c0_8, %c0_9] : memref<8x128xf32, #tpu.memory_space<vmem>>, vector<8x128xf32>
    tpu.vector_store %arg3[%c0_8, %c0_9], %222 {strides = array<i32>} : memref<8x128xf32, #tpu.memory_space<vmem>>, vector<8x128xf32>,
    return
  }
  func.func @transform_0(%arg0: i32) -> (i32, i32) {
    %c0_i32 = arith.constant 0 : i32
    %c0_i32_0 = arith.constant 0 : i32
    return %arg0, %c0_i32 : i32, i32
  }
  func.func @transform_1(%arg0: i32) -> (i32, i32) {
    %c0_i32 = arith.constant 0 : i32
    %c0_i32_0 = arith.constant 0 : i32
    %c0_i32_1 = arith.constant 0 : i32
    return %c0_i32, %c0_i32_0 : i32, i32
  }
  func.func @transform_2(%arg0: i32) -> (i32, i32) {
    %c0_i32 = arith.constant 0 : i32
    %c0_i32_0 = arith.constant 0 : i32
    return %arg0, %c0_i32 : i32, i32
  }
}

</mosaic_0001>

<bundles_post_ra>
// kernel: tpu_custom_call.1
= control target key start
LH: loop header
LB: loop body
LE: loop exit
PB: predicated region body
PF: predicated region fallthrough
CT: control target
= control target key end

     0   :  { %7 = vsyncpa [#allocation3], 0  ;;  %s731_s0 = inlined_call_operand.hbm [shape: f32[8,128], index: 0, kind: input, shape index: {}]   ;;  %s732_s1 = inlined_call_operand.hbm [shape: f32[408,128], index: 1, kind: input, shape index: {}]   ;;  %s733_s2 = inlined_call_operand.hbm [shape: f32[8,128], index: 2, kind: output, shape index: {}]  }
   0x1   :  { %8 = vsyncpa [#allocation6], 0 }
   0x2   :  { %9 = vsyncpa [#allocation4], 0  ;;  %s556_s9 = smov [#allocation2]   ;;  %s557_s11 = smov [#allocation5]  }
   0x3   :  { %s16_s10 = sshll.u32 %s556_s9, 4  ;;  %s25_s12 = sshll.u32 %s557_s11, 4  ;;  %s17_s10 = int_to_ptr.vmem [resolvable:$true] %s16_s10  ;;  %s592_s12 = int_to_ptr.vmem [resolvable:$true] %s25_s12 }
   0x4   :  { %s484_s15 = scalar_lea.hbm %s731_s0, 128 }
   0x5   :  { %p485_p0 = scmp.ne.s32.totalorder %s731_s0, %s484_s15  ;;  %p488_p1 = scmp.lt.u32.totalorder %s484_s15, %s731_s0 }
   0x7   :  { %p490_p2 = pnand %p488_p1, %p485_p0 }
   0x9   :  { %493 = shalt.err (!%p490_p2)
}
   0xa   :  { %s494_s20 = scalar_lea.vmem %s17_s10, 128  ;;  %p499_p4 = scmp.lt.s32.totalorder %s17_s10, %s17_s10 }
   0xb   :  { %p495_p3 = scmp.ne.s32.totalorder %s17_s10, %s494_s20  ;;  %p500_p5 = scmp.lt.s32.totalorder %s494_s20, %s494_s20 }
   0xd   :  { %p501_p6 = por %p500_p5, %p499_p4 }
   0xf   :  { %p502_p7 = pnand %p501_p6, %p495_p3 }
  0x11   :  { %505 = shalt.err (!%p502_p7)
}
  0x12   :  { %19 = dma.hbm_to_vmem [thread:$0]  %s731_s0, 128, %s17_s10, [#allocation3]  }
  0x13   :  { %s506_s25 = scalar_lea.hbm %s732_s1, 6528 }
  0x14   :  { %p507_p8 = scmp.ne.s32.totalorder %s732_s1, %s506_s25  ;;  %p510_p9 = scmp.lt.u32.totalorder %s506_s25, %s732_s1 }
  0x16   :  { %p512_p10 = pnand %p510_p9, %p507_p8 }
  0x18   :  { %515 = shalt.err (!%p512_p10)
}
  0x19   :  { %s516_s30 = scalar_lea.vmem %s592_s12, 6528  ;;  %p521_p12 = scmp.lt.s32.totalorder %s592_s12, %s592_s12 }
  0x1a   :  { %p517_p11 = scmp.ne.s32.totalorder %s592_s12, %s516_s30  ;;  %p522_p13 = scmp.lt.s32.totalorder %s516_s30, %s516_s30 }
  0x1c   :  { %p523_p0 = por %p522_p13, %p521_p12 }
  0x1e   :  { %p524_p1 = pnand %p523_p0, %p517_p11 }
  0x20   :  { %527 = shalt.err (!%p524_p1)
}
  0x21   :  { %s558_s0 = smov 128   ;;  %s559_s3 = smov 8  }
  0x22   :  { %31 = dma.hbm_to_vmem [thread:$0]  %s732_s1, 6528, %s592_s12, [#allocation6], %s558_s0, %s558_s0, %s559_s3  }
  0x23   :  { %550 = dma.done.wait [#allocation3], 128  }
  0x24   :  { %551 = vsyncadd [#allocation3], 4294967168 }
  0x25   :  { %552 = dma.done.wait [#allocation6], 6528  }
  0x26   :  { %553 = vsyncadd [#allocation6], 4294960768  ;;  %v560_v0 = vmov 0   ;;  %v38_v1 = vld [vmem:[#allocation2] sm:$0xff]  ;;  %v561_v2 = vmov 1   ;;  %v562_v3 = vmov 3   ;;  %v41_v4 = vlaneseq }
  0x27   :  { %443 = vset.pattern.permute.xlu0 %v560_v0  ;;  %445 = vset.pattern.permute.xlu1 %v560_v0  ;;  %v40_v7 = vld [vmem:[#allocation5] sm:$0xff]  ;;  %v563_v20 = vmov 6   ;;  %v564_v21 = vmov 9   ;;  %v565_v22 = vmov 2   ;;  %v566_v23 = vmov 12   ;;  %v68_v33 = vld [vmem:[#allocation5 + $0x88] sm:$0xff] }
  0x28   :  { %47 = vperm.xlu0 %443, %v38_v1   ;;  %v627_v5 = vshrl.u32 %v41_v4, 7  ;;  %v39_v10 = vld [vmem:[#allocation5 + $0x80] sm:$0xff]  ;;  %v567_v24 = vmov 4   ;;  %v568_v25 = vmov 15   ;;  %v569_v26 = vmov 5   ;;  %v67_v36 = vld [vmem:[#allocation5 + $0x108] sm:$0xff] }
  0x29   :  { %v570_v27 = vmov 7   ;;  %v571_v28 = vmov 8   ;;  %v572_v29 = vmov 10   ;;  %v573_v30 = vmov 11   ;;  %s576_s1 = smov [#allocation7]  }
  0x2a   :  { %v630_v6 = vsub.s32 0, %v627_v5  ;;  %v634_v9 = vsub.s32 1, %v627_v5  ;;  %v574_v31 = vmov 13   ;;  %v575_v32 = vmov 14   ;;  %s412_s6 = sshll.u32 %s576_s1, 4  ;;  %s413_s6 = int_to_ptr.vmem [resolvable:$true] %s412_s6 }
  0x2b   :  { %v655_v38 = vsub.s32 2, %v627_v5  ;;  %v659_v42 = vsub.s32 3, %v627_v5  ;;  %v663_v46 = vsub.s32 4, %v627_v5  ;;  %v668_v54 = vsub.s32 5, %v627_v5  ;;  %s528_s7 = scalar_lea.vmem %s413_s6, 128  ;;  %p533_p3 = scmp.lt.s32.totalorder %s413_s6, %s413_s6 }
  0x2c   :  { %444 = vset.pattern.permute.xlu0 %v561_v2  ;;  %v53_v8 = vrot.slane %v40_v7, %v630_v6  ;;  %v44_v12 = vrot.slane %v39_v10, %v630_v6  ;;  %v63_v14 = vrot.slane %v40_v7, %v634_v9  ;;  %v82_v35 = vrot.slane %v68_v33, %v630_v6  ;;  %p529_p2 = scmp.ne.s32.totalorder %s413_s6, %s528_s7  ;;  %p534_p4 = scmp.lt.s32.totalorder %s528_s7, %s528_s7 }
  0x2d   :  { %57 = vperm.xlu0 %444, %v38_v1   ;;  %v92_v37 = vrot.slane %v68_v33, %v634_v9  ;;  %v73_v39 = vrot.slane %v67_v36, %v630_v6  ;;  %v102_v44 = vrot.slane %v68_v33, %v655_v38  ;;  %v112_v48 = vrot.slane %v68_v33, %v659_v42 }
  0x2e   :  { %v122_v53 = vrot.slane %v68_v33, %v663_v46  ;;  %v671_v57 = vsub.s32 6, %v627_v5  ;;  %v132_v60 = vrot.slane %v68_v33, %v668_v54  ;;  %p535_p5 = por %p534_p4, %p533_p3 }
  0x30   :  { %v142_v62 = vrot.slane %v68_v33, %v671_v57  ;;  %p536_p6 = pnand %p535_p5, %p529_p2 }
  0x31   :  { %448 = vset.pattern.permute.xlu0 %v562_v3 }
  0xa7   :  { %v48_v11 = vpop.permute.xlu0 %47 }
  0xa8   :  { %v54_v13 = vmul.f32 %v53_v8, %v48_v11 }
  0xaa   :  { %v55_v16 = vadd.f32 %v54_v13, %v44_v12  ;;  %v69_v12 = vld [vmem:[#allocation5 + $0x90] sm:$0xff] }
  0xac   :  { %v58_v15 = vpop.permute.xlu0 %57 }
  0xad   :  { %v64_v17 = vmul.f32 %v63_v14, %v58_v15  ;;  %v162_v15 = vrot.slane %v69_v12, %v630_v6 }
  0xaf   :  { %v65_v18 = vadd.f32 %v64_v17, %v55_v16  ;;  %v172_v17 = vrot.slane %v69_v12, %v634_v9 }
  0xb1   :  { %478 = vtanh.f32 %v65_v18 }
  0xbb   :  { %v479_v19 = vpop.eup %478 }
  0xbc   :  { %106 = vperm.xlu0 %448, %v479_v19   ;;  %76 = vperm.xlu1 %445, %v479_v19  }
  0xc0   :  { %451 = vset.pattern.permute.xlu0 %v563_v20  ;;  %446 = vset.pattern.permute.xlu1 %v561_v2 }
  0xc1   :  { %136 = vperm.xlu0 %451, %v479_v19   ;;  %86 = vperm.xlu1 %446, %v479_v19  }
  0xc5   :  { %454 = vset.pattern.permute.xlu0 %v564_v21  ;;  %447 = vset.pattern.permute.xlu1 %v565_v22 }
  0xc6   :  { %166 = vperm.xlu0 %454, %v479_v19   ;;  %96 = vperm.xlu1 %447, %v479_v19  }
  0xca   :  { %457 = vset.pattern.permute.xlu0 %v566_v23  ;;  %449 = vset.pattern.permute.xlu1 %v567_v24 }
  0xcb   :  { %196 = vperm.xlu0 %457, %v479_v19   ;;  %116 = vperm.xlu1 %449, %v479_v19  }
  0xcf   :  { %460 = vset.pattern.permute.xlu0 %v568_v25  ;;  %450 = vset.pattern.permute.xlu1 %v569_v26 }
  0xd0   :  { %226 = vperm.xlu0 %460, %v479_v19   ;;  %126 = vperm.xlu1 %450, %v479_v19  }
  0xd4   :  { %452 = vset.pattern.permute.xlu1 %v570_v27  ;;  %463 = vset.pattern.permute.xlu0 %v565_v22 }
  0xd5   :  { %146 = vperm.xlu1 %452, %v479_v19  }
  0xd9   :  { %453 = vset.pattern.permute.xlu1 %v571_v28 }
  0xda   :  { %156 = vperm.xlu1 %453, %v479_v19  }
  0xde   :  { %455 = vset.pattern.permute.xlu1 %v572_v29 }
  0xdf   :  { %176 = vperm.xlu1 %455, %v479_v19  }
  0xe3   :  { %456 = vset.pattern.permute.xlu1 %v573_v30 }
  0xe4   :  { %186 = vperm.xlu1 %456, %v479_v19  }
  0xe8   :  { %458 = vset.pattern.permute.xlu1 %v574_v31 }
  0xe9   :  { %206 = vperm.xlu1 %458, %v479_v19  }
  0xed   :  { %459 = vset.pattern.permute.xlu1 %v575_v32 }
  0xee   :  { %216 = vperm.xlu1 %459, %v479_v19  }
  0xf2   :  { %461 = vset.pattern.permute.xlu1 %v560_v0  ;;  %v676_v0 = vsub.s32 7, %v627_v5 }
  0xf4   :  { %v152_v8 = vrot.slane %v68_v33, %v676_v0 }
 0x13b   :  { %v77_v34 = vpop.permute.xlu1 %76  ;;  %v107_v51 = vpop.permute.xlu0 %106 }
 0x13c   :  { %v83_v40 = vmul.f32 %v82_v35, %v77_v34  ;;  %v113_v55 = vmul.f32 %v112_v48, %v107_v51  ;;  %v182_v34 = vrot.slane %v69_v12, %v655_v38  ;;  %v212_v48 = vrot.slane %v69_v12, %v668_v54 }
 0x13e   :  { %v84_v45 = vadd.f32 %v83_v40, %v73_v39  ;;  %v192_v39 = vrot.slane %v69_v12, %v659_v42 }
 0x140   :  { %v87_v41 = vpop.permute.xlu1 %86  ;;  %v137_v4 = vpop.permute.xlu0 %136 }
 0x141   :  { %v93_v43 = vmul.f32 %v92_v37, %v87_v41  ;;  %v143_v10 = vmul.f32 %v142_v62, %v137_v4  ;;  %v202_v41 = vrot.slane %v69_v12, %v663_v46 }
 0x143   :  { %v94_v49 = vadd.f32 %v93_v43, %v84_v45 }
 0x145   :  { %v97_v47 = vpop.permute.xlu1 %96  ;;  %v167_v22 = vpop.permute.xlu0 %166 }
 0x146   :  { %v103_v50 = vmul.f32 %v102_v44, %v97_v47  ;;  %v173_v35 = vmul.f32 %v172_v17, %v167_v22 }
 0x148   :  { %v104_v52 = vadd.f32 %v103_v50, %v94_v49 }
 0x14a   :  { %v117_v56 = vpop.permute.xlu1 %116  ;;  %v114_v58 = vadd.f32 %v113_v55, %v104_v52  ;;  %v197_v45 = vpop.permute.xlu0 %196  ;;  %v232_v55 = vrot.slane %v69_v12, %v676_v0 }
 0x14b   :  { %v123_v59 = vmul.f32 %v122_v53, %v117_v56  ;;  %v203_v49 = vmul.f32 %v202_v41, %v197_v45  ;;  %v222_v53 = vrot.slane %v69_v12, %v671_v57 }
 0x14d   :  { %v124_v63 = vadd.f32 %v123_v59, %v114_v58 }
 0x14f   :  { %v127_v61 = vpop.permute.xlu1 %126  ;;  %v227_v56 = vpop.permute.xlu0 %226 }
 0x150   :  { %v133_v1 = vmul.f32 %v132_v60, %v127_v61  ;;  %v233_v61 = vmul.f32 %v232_v55, %v227_v56 }
 0x152   :  { %v134_v7 = vadd.f32 %v133_v1, %v124_v63 }
 0x154   :  { %v147_v11 = vpop.permute.xlu1 %146  ;;  %v144_v13 = vadd.f32 %v143_v10, %v134_v7 }
 0x155   :  { %v153_v14 = vmul.f32 %v152_v8, %v147_v11 }
 0x157   :  { %v154_v18 = vadd.f32 %v153_v14, %v144_v13 }
 0x159   :  { %v157_v16 = vpop.permute.xlu1 %156 }
 0x15a   :  { %v163_v19 = vmul.f32 %v162_v15, %v157_v16 }
 0x15c   :  { %v164_v5 = vadd.f32 %v163_v19, %v154_v18 }
 0x15e   :  { %v177_v36 = vpop.permute.xlu1 %176  ;;  %v174_v37 = vadd.f32 %v173_v35, %v164_v5 }
 0x15f   :  { %v183_v33 = vmul.f32 %v182_v34, %v177_v36  ;;  %v238_v36 = vld [vmem:[#allocation5 + $0x118] sm:$0xff] }
 0x161   :  { %v184_v43 = vadd.f32 %v183_v33, %v174_v37  ;;  %v331_v33 = vrot.slane %v238_v36, %v630_v6 }
 0x163   :  { %v187_v40 = vpop.permute.xlu1 %186 }
 0x164   :  { %v193_v44 = vmul.f32 %v192_v39, %v187_v40 }
 0x166   :  { %v194_v47 = vadd.f32 %v193_v44, %v184_v43  ;;  %v341_v44 = vrot.slane %v238_v36, %v634_v9 }
 0x168   :  { %v207_v50 = vpop.permute.xlu1 %206  ;;  %v204_v51 = vadd.f32 %v203_v49, %v194_v47 }
 0x169   :  { %v213_v52 = vmul.f32 %v212_v48, %v207_v50  ;;  %v351_v50 = vrot.slane %v238_v36, %v655_v38 }
 0x16b   :  { %v214_v59 = vadd.f32 %v213_v52, %v204_v51  ;;  %v361_v52 = vrot.slane %v238_v36, %v659_v42 }
 0x16d   :  { %v217_v58 = vpop.permute.xlu1 %216 }
 0x16e   :  { %v223_v60 = vmul.f32 %v222_v53, %v217_v58 }
 0x170   :  { %v224_v62 = vadd.f32 %v223_v60, %v214_v59 }
 0x172   :  { %v234_v63 = vadd.f32 %v233_v61, %v224_v62 }
 0x174   :  { %480 = vtanh.f32 %v234_v63  ;;  %v391_v63 = vrot.slane %v238_v36, %v671_v57 }
 0x17e   :  { %v481_v1 = vpop.eup %480 }
 0x17f   :  { %265 = vperm.xlu0 %463, %v481_v1   ;;  %245 = vperm.xlu1 %461, %v481_v1  }
 0x183   :  { %466 = vset.pattern.permute.xlu0 %v569_v26  ;;  %462 = vset.pattern.permute.xlu1 %v561_v2  ;;  %v237_v2 = vld [vmem:[#allocation5 + $0x110] sm:$0xff] }
 0x184   :  { %295 = vperm.xlu0 %466, %v481_v1   ;;  %255 = vperm.xlu1 %462, %v481_v1   ;;  %v291_v11 = vrot.slane %v237_v2, %v663_v46  ;;  %v301_v13 = vrot.slane %v237_v2, %v668_v54  ;;  %v311_v18 = vrot.slane %v237_v2, %v671_v57 }
 0x185   :  { %v321_v35 = vrot.slane %v237_v2, %v676_v0 }
 0x188   :  { %469 = vset.pattern.permute.xlu0 %v571_v28  ;;  %464 = vset.pattern.permute.xlu1 %v562_v3  ;;  %v251_v3 = vrot.slane %v237_v2, %v630_v6 }
 0x189   :  { %325 = vperm.xlu0 %469, %v481_v1   ;;  %275 = vperm.xlu1 %464, %v481_v1  }
 0x18d   :  { %472 = vset.pattern.permute.xlu0 %v573_v30  ;;  %465 = vset.pattern.permute.xlu1 %v567_v24 }
 0x18e   :  { %355 = vperm.xlu0 %472, %v481_v1   ;;  %285 = vperm.xlu1 %465, %v481_v1  }
 0x192   :  { %475 = vset.pattern.permute.xlu0 %v575_v32  ;;  %467 = vset.pattern.permute.xlu1 %v563_v20  ;;  %v236_v20 = vld [vmem:[#allocation5 + $0x190] sm:$0xff] }
 0x193   :  { %385 = vperm.xlu0 %475, %v481_v1   ;;  %305 = vperm.xlu1 %467, %v481_v1  }
 0x197   :  { %468 = vset.pattern.permute.xlu1 %v570_v27  ;;  %477 = vset.pattern.permute.xlu0 %v568_v25  ;;  %v261_v27 = vrot.slane %v237_v2, %v634_v9  ;;  %v381_v9 = vrot.slane %v238_v36, %v668_v54 }
 0x198   :  { %315 = vperm.xlu1 %468, %v481_v1  }
 0x19c   :  { %470 = vset.pattern.permute.xlu1 %v564_v21  ;;  %v242_v21 = vrot.slane %v236_v20, %v630_v6  ;;  %v371_v6 = vrot.slane %v238_v36, %v663_v46 }
 0x19d   :  { %335 = vperm.xlu1 %470, %v481_v1  }
 0x1a1   :  { %471 = vset.pattern.permute.xlu1 %v572_v29 }
 0x1a2   :  { %345 = vperm.xlu1 %471, %v481_v1  }
 0x1a6   :  { %473 = vset.pattern.permute.xlu1 %v566_v23  ;;  %v271_v23 = vrot.slane %v237_v2, %v655_v38 }
 0x1a7   :  { %365 = vperm.xlu1 %473, %v481_v1  }
 0x1ab   :  { %474 = vset.pattern.permute.xlu1 %v574_v31 }
 0x1ac   :  { %375 = vperm.xlu1 %474, %v481_v1  }
 0x1b0   :  { %476 = vset.pattern.permute.xlu1 %v568_v25  ;;  %v281_v25 = vrot.slane %v237_v2, %v659_v42  ;;  %v401_v42 = vrot.slane %v238_v36, %v676_v0 }
 0x1b1   :  { %395 = vperm.xlu1 %476, %v481_v1  }
 0x1fe   :  { %v246_v24 = vpop.permute.xlu1 %245  ;;  %v266_v31 = vpop.permute.xlu0 %265 }
 0x1ff   :  { %v252_v26 = vmul.f32 %v251_v3, %v246_v24  ;;  %v272_v4 = vmul.f32 %v271_v23, %v266_v31 }
 0x201   :  { %v253_v29 = vadd.f32 %v252_v26, %v242_v21 }
 0x203   :  { %v256_v28 = vpop.permute.xlu1 %255  ;;  %v296_v16 = vpop.permute.xlu0 %295 }
 0x204   :  { %v262_v30 = vmul.f32 %v261_v27, %v256_v28  ;;  %v302_v19 = vmul.f32 %v301_v13, %v296_v16 }
 0x206   :  { %v263_v32 = vadd.f32 %v262_v30, %v253_v29 }
 0x208   :  { %v276_v7 = vpop.permute.xlu1 %275  ;;  %v273_v8 = vadd.f32 %v272_v4, %v263_v32  ;;  %v326_v41 = vpop.permute.xlu0 %325 }
 0x209   :  { %v282_v10 = vmul.f32 %v281_v25, %v276_v7  ;;  %v332_v45 = vmul.f32 %v331_v33, %v326_v41 }
 0x20b   :  { %v283_v14 = vadd.f32 %v282_v10, %v273_v8 }
 0x20d   :  { %v286_v12 = vpop.permute.xlu1 %285  ;;  %v356_v56 = vpop.permute.xlu0 %355 }
 0x20e   :  { %v292_v15 = vmul.f32 %v291_v11, %v286_v12  ;;  %v362_v59 = vmul.f32 %v361_v52, %v356_v56 }
 0x210   :  { %v293_v17 = vadd.f32 %v292_v15, %v283_v14 }
 0x212   :  { %v306_v22 = vpop.permute.xlu1 %305  ;;  %v303_v5 = vadd.f32 %v302_v19, %v293_v17  ;;  %v386_v1 = vpop.permute.xlu0 %385 }
 0x213   :  { %v312_v34 = vmul.f32 %v311_v18, %v306_v22  ;;  %v392_v20 = vmul.f32 %v391_v63, %v386_v1 }
 0x215   :  { %v313_v39 = vadd.f32 %v312_v34, %v303_v5 }
 0x217   :  { %v316_v37 = vpop.permute.xlu1 %315 }
 0x218   :  { %v322_v40 = vmul.f32 %v321_v35, %v316_v37 }
 0x21a   :  { %v323_v43 = vadd.f32 %v322_v40, %v313_v39 }
 0x21c   :  { %v336_v47 = vpop.permute.xlu1 %335  ;;  %v333_v48 = vadd.f32 %v332_v45, %v323_v43 }
 0x21d   :  { %v342_v49 = vmul.f32 %v341_v44, %v336_v47 }
 0x21f   :  { %v343_v53 = vadd.f32 %v342_v49, %v333_v48 }
 0x221   :  { %v346_v51 = vpop.permute.xlu1 %345 }
 0x222   :  { %v352_v55 = vmul.f32 %v351_v50, %v346_v51 }
 0x224   :  { %v353_v58 = vadd.f32 %v352_v55, %v343_v53 }
 0x226   :  { %v366_v60 = vpop.permute.xlu1 %365  ;;  %v363_v61 = vadd.f32 %v362_v59, %v353_v58 }
 0x227   :  { %v372_v62 = vmul.f32 %v371_v6, %v366_v60 }
 0x229   :  { %v373_v38 = vadd.f32 %v372_v62, %v363_v61 }
 0x22b   :  { %v376_v2 = vpop.permute.xlu1 %375 }
 0x22c   :  { %v382_v3 = vmul.f32 %v381_v9, %v376_v2 }
 0x22e   :  { %v383_v24 = vadd.f32 %v382_v3, %v373_v38 }
 0x230   :  { %v393_v21 = vadd.f32 %v392_v20, %v383_v24  ;;  %v396_v26 = vpop.permute.xlu1 %395 }
 0x231   :  { %v402_v27 = vmul.f32 %v401_v42, %v396_v26 }
 0x233   :  { %v403_v46 = vadd.f32 %v402_v27, %v393_v21 }
 0x235   :  { %482 = vtanh.f32 %v403_v46 }
 0x23f   :  { %v483_v28 = vpop.eup %482 }
 0x240   :  { %405 = vst [vmem:[#allocation7] sm:$0xff] %v483_v28 }
 0x241   :  { %539 = shalt.err (!%p536_p6)
}
 0x242   :  { %s540_s10 = scalar_lea.hbm %s733_s2, 128 }
 0x243   :  { %p541_p7 = scmp.ne.s32.totalorder %s733_s2, %s540_s10  ;;  %p544_p8 = scmp.lt.u32.totalorder %s540_s10, %s733_s2 }
 0x245   :  { %p546_p9 = pnand %p544_p8, %p541_p7 }
 0x247   :  { %549 = shalt.err (!%p546_p9)
}
 0x248   :  { %415 = dma.vmem_to_hbm [thread:$0]  %s413_s6, 128, %s733_s2, [#allocation4]  }
 0x249   :  { %554 = dma.done.wait [#allocation4], 128  }
 0x24a   :  { %555 = vsyncadd [#allocation4], 4294967168 }
 0x24b   :  { %419 = vsyncpa [#allocation3], 1 }
 0x24c   :  { %420 = vsyncpa [#allocation6], 1 }
 0x24d   :  { %421 = vsyncpa [#allocation4], 1 }

</bundles_post_ra>
